<compile_context>
chip_gen: v7x
topology: tpu7x:2x2x1
jax: 0.10.0
libtpu: 0.0.40
codegen_flags: <defaults>
</compile_context>

<pallas_src>
import functools
import math

import jax
import jax.numpy as jnp
from jax.experimental import pallas as pl
from jax.experimental.pallas import tpu as pltpu

_LANES = 128
_SUBLANES = 8
_MAX_BLOCK_ROWS = 8192
_TARGET_PAIR_TILE_BYTES = 8 * 1024 * 1024   # x-tile + y-tile bytes per grid step
_VMEM_LIMIT_BYTES = 32 * 1024 * 1024        # <= physical VMEM on v5e/v6e/v7x


def _round_up(v, m):
    return (v + m - 1) // m * m


def _default_num_chunks():
    # Two resident partial-sum blocks only pay off when two TensorCores share
    # the grid (megacore parts); single-TC v5e/v6e just get extra index math.
    try:
        kind = jax.devices()[0].device_kind.lower()
    except Exception:
        return 1
    return 2 if ("v7" in kind or "v4" in kind) else 1


def _static_pow(base, gamma):
    """base ** gamma with gamma a static Python scalar.

    Small non-negative integer gammas (the usual ASL configs) use VPU
    multiplies (square-and-multiply); gamma == 0 returns ones exactly
    (torch.pow(0., 0.) == 1).  Other gammas fall back to exp/log on the EUP.
    """
    g = float(gamma)
    if g == 0.0:
        return jnp.ones_like(base)
    if g.is_integer() and 0 < g <= 8:
        n = int(g)
        result = None
        p = base
        while n:
            if n & 1:
                result = p if result is None else result * p
            n >>= 1
            if n:
                p = p * p
        return result
    safe = jnp.maximum(base, 1e-30)
    return jnp.where(base > 0.0, jnp.exp(g * jnp.log(safe)), 0.0)


def _asl_kernel(x_ref, y_ref, acc_ref, *, gamma_neg, gamma_pos, clip, eps,
                rows_valid, tile_rows, steps_per_chunk, needs_mask):
    chunk = pl.program_id(0)
    step = pl.program_id(1)

    @pl.when(step == 0)
    def _init():
        acc_ref[...] = jnp.zeros_like(acc_ref)

    # Load in native dtype, widen x in-register.  y is a *binarized*
    # multi-label target and is only used as a predicate (soft labels are not
    # supported by the fused log(select) formulation below).
    x = x_ref[...].astype(jnp.float32)
    y = y_ref[...]
    if jnp.issubdtype(y.dtype, jnp.bool_):
        is_pos = y
    else:
        is_pos = y > 0

    # Sigmoid with a single EUP push (tanh); xs_neg stays a VPU subtract.
    xs_pos = 0.5 * jnp.tanh(0.5 * x) + 0.5
    xs_neg = 1.0 - xs_pos
    if clip is not None and clip > 0:
        xs_neg = jnp.minimum(xs_neg + clip, 1.0)

    # Fused CE term: y*log(p+) + (1-y)*log(p-) == log(select) for binary y.
    p_sel = jnp.where(is_pos, xs_pos, xs_neg)
    loss = jnp.log(jnp.clip(p_sel, eps, 1.0 - eps))

    if gamma_neg > 0 or gamma_pos > 0:
        if gamma_pos == gamma_neg:
            w = _static_pow(1.0 - p_sel, gamma_pos)       # pt == p_sel for binary y
        else:
            w = jnp.where(is_pos,
                          _static_pow(1.0 - xs_pos, gamma_pos),
                          _static_pow(1.0 - xs_neg, gamma_neg))
        loss = loss * w

    c = loss.shape[-1]

    def _accum(vals):
        # Sublane-group partial sums: pure VPU adds into the resident (8, C)
        # accumulator; no per-step cross-lane reduce.
        acc_ref[...] += jnp.sum(
            vals.reshape(tile_rows // _SUBLANES, _SUBLANES, c), axis=0)

    if needs_mask:
        block = chunk * steps_per_chunk + step
        valid = rows_valid - block * tile_rows   # rows of this tile that exist

        @pl.when(valid >= tile_rows)             # hot path: fully valid tile
        def _full():
            _accum(loss)

        @pl.when(valid < tile_rows)              # at most one partial/overhang tile
        def _partial():
            row = jax.lax.broadcasted_iota(jnp.int32, loss.shape, 0)
            _accum(jnp.where(row < valid, loss, 0.0))
    else:
        _accum(loss)


def asymmetric_loss(x, y, *, gamma_neg=4, gamma_pos=1, clip=0.05, eps=1e-8,
                    block_rows=None, num_chunks=None):
    """Pallas TPU implementation of AsymmetricLoss.forward -> scalar (-loss.sum()).

    `y` must be a binarized multi-label target (0/1, any dtype); soft labels
    are not supported by the fused log(select) formulation.
    """
    assert x.shape == y.shape, (x.shape, y.shape)
    if x.ndim == 0:
        x = x[None]
        y = y[None]

    # Natural layout: merge leading dims only (a no-op for the common 2-D
    # (batch, num_classes) input); the class dim stays minor so no full-array
    # pad / relayout is materialized in HBM.
    C = x.shape[-1]
    R = math.prod(x.shape[:-1])
    x2 = x.reshape(R, C)
    y2 = y.reshape(R, C)
    if jnp.issubdtype(y2.dtype, jnp.bool_):
        y2 = y2.astype(jnp.int8)   # 1 byte/elem either way; friendlier layout

    # Row-tile sizing from a VMEM byte budget (x+y tile pair, double-buffered
    # by the pipeline).  Align rows to the native sublane tiling of the
    # narrowest dtype so partial tiles stay layout-friendly.
    row_align = max(_SUBLANES,
                    _SUBLANES * (4 // x2.dtype.itemsize),
                    _SUBLANES * (4 // y2.dtype.itemsize))
    c_lanes = _round_up(C, _LANES)                 # VMEM lane footprint per row
    pair_row_bytes = c_lanes * (x2.dtype.itemsize + y2.dtype.itemsize)
    if block_rows is None:
        tile_r = min(_TARGET_PAIR_TILE_BYTES // pair_row_bytes, _MAX_BLOCK_ROWS)
    else:
        tile_r = block_rows
    tile_r = max(row_align, tile_r // row_align * row_align)
    tile_r = min(tile_r, _round_up(R, row_align))

    num_blocks = pl.cdiv(R, tile_r)
    if num_chunks is None:
        num_chunks = _default_num_chunks()
    chunks = max(1, min(num_chunks, num_blocks))
    steps_per_chunk = pl.cdiv(num_blocks, chunks)
    needs_mask = chunks * steps_per_chunk * tile_r != R
    last_block = num_blocks - 1

    kernel = functools.partial(
        _asl_kernel,
        gamma_neg=gamma_neg, gamma_pos=gamma_pos, clip=clip, eps=eps,
        rows_valid=R, tile_rows=tile_r, steps_per_chunk=steps_per_chunk,
        needs_mask=needs_mask)

    def in_index_map(c_idx, i_idx):
        # Clamp so any overhang step (chunks * steps > num_blocks) re-reads the
        # last valid tile; its contribution is zeroed by the in-kernel mask.
        return (jnp.minimum(c_idx * steps_per_chunk + i_idx, last_block), 0)

    in_spec = pl.BlockSpec((tile_r, C), in_index_map)
    out_spec = pl.BlockSpec((_SUBLANES, C), lambda c_idx, i_idx: (c_idx, 0))

    n = R * C
    cost = pl.CostEstimate(
        flops=14 * n,
        transcendentals=2 * n,            # 1 tanh + 1 log per element
        bytes_accessed=(x2.size * x2.dtype.itemsize
                        + y2.size * y2.dtype.itemsize
                        + chunks * _SUBLANES * C * 4))

    partial_sums = pl.pallas_call(
        kernel,
        out_shape=jax.ShapeDtypeStruct((chunks * _SUBLANES, C), jnp.float32),
        grid=(chunks, steps_per_chunk),
        in_specs=[in_spec, in_spec],
        out_specs=out_spec,
        compiler_params=pltpu.CompilerParams(
            # chunk axis shards across TensorCores on megacore parts; step axis
            # is the resident-accumulator streaming/reduction axis.
            dimension_semantics=("parallel", "arbitrary"),
            vmem_limit_bytes=_VMEM_LIMIT_BYTES),
        cost_estimate=cost,
    )(x2, y2)

    # Single cross-lane reduce + negate, once, outside the hot loop.
    return -jnp.sum(partial_sums)


def _reference_asl(x, y, gamma_neg=4, gamma_pos=1, clip=0.05, eps=1e-8):
    # Pure-JAX mirror of the PyTorch module, for the self-test.
    x = x.astype(jnp.float32)
    y = y.astype(jnp.float32)
    xs_pos = jax.nn.sigmoid(x)
    xs_neg = 1.0 - xs_pos
    if clip is not None and clip > 0:
        xs_neg = jnp.minimum(xs_neg + clip, 1.0)
    los_pos = y * jnp.log(jnp.clip(xs_pos, eps, 1.0 - eps))
    los_neg = (1.0 - y) * jnp.log(jnp.clip(xs_neg, eps, 1.0 - eps))
    loss = los_pos + los_neg
    if gamma_neg > 0 or gamma_pos > 0:
        pt = xs_pos * y + xs_neg * (1.0 - y)
        gamma = gamma_pos * y + gamma_neg * (1.0 - y)
        loss = loss * jnp.power(1.0 - pt, gamma)
    return -jnp.sum(loss)


# TODO(synk): disable_torch_grad_focal_loss only toggles autograd on the focal
# weight in PyTorch; it does not change the forward value, so it is omitted.


if __name__ == "__main__":
    key = jax.random.PRNGKey(0)
    kx, ky = jax.random.split(key)

    # 1) Multi-label logits/targets (batch, num_classes): no-mask fast path.
    B, C = 8, 16
    x = jax.random.normal(kx, (B, C), dtype=jnp.float32)
    y = (jax.random.uniform(ky, (B, C)) > 0.5).astype(jnp.float32)
    loss = asymmetric_loss(x, y)
    jax.block_until_ready(loss)
    ref = _reference_asl(x, y)
    assert jnp.allclose(loss, ref, rtol=1e-5, atol=1e-5), (loss, ref)

    # 2) Ragged shape: partial final row tile exercises the pl.when mask path.
    B2, C2 = 6, 37
    x2 = jax.random.normal(kx, (B2, C2), dtype=jnp.float32)
    y2 = (jax.random.uniform(ky, (B2, C2)) > 0.5).astype(jnp.float32)
    loss2 = asymmetric_loss(x2, y2)
    jax.block_until_ready(loss2)
    ref2 = _reference_asl(x2, y2)
    assert jnp.allclose(loss2, ref2, rtol=1e-5, atol=1e-5), (loss2, ref2)

    # 3) Multi-step streaming grid: resident accumulator across several tiles.
    B3, C3 = 64, 100
    x3 = jax.random.normal(kx, (B3, C3), dtype=jnp.float32)
    y3 = (jax.random.uniform(ky, (B3, C3)) > 0.5).astype(jnp.float32)
    loss3 = asymmetric_loss(x3, y3, block_rows=16)
    jax.block_until_ready(loss3)
    ref3 = _reference_asl(x3, y3)
    assert jnp.allclose(loss3, ref3, rtol=1e-5, atol=1e-5), (loss3, ref3)

    # 4) bf16 logits + int8 targets: native-dtype loads, no f32 pre-cast in HBM.
    B4, C4 = 32, 128
    x4 = jax.random.normal(kx, (B4, C4), dtype=jnp.float32).astype(jnp.bfloat16)
    y4 = (jax.random.uniform(ky, (B4, C4)) > 0.5).astype(jnp.int8)
    loss4 = asymmetric_loss(x4, y4)
    jax.block_until_ready(loss4)
    ref4 = _reference_asl(x4.astype(jnp.float32), y4.astype(jnp.float32))
    assert jnp.allclose(loss4, ref4, rtol=1e-3, atol=1e-3), (loss4, ref4)

    print("KERNEL_OK")
</pallas_src>

<mosaic_0001>
module attributes {stable_mosaic.version = 11 : i64} {
  func.func @_asl_kernel(%arg0: i32, %arg1: i32, %arg2: memref<8x16xf32, #tpu.memory_space<vmem>>, %arg3: memref<8x16xf32, #tpu.memory_space<vmem>>, %arg4: memref<8x16xf32, #tpu.memory_space<vmem>>) attributes {dimension_semantics = [#tpu.dimension_semantics<parallel>, #tpu.dimension_semantics<arbitrary>], iteration_bounds = array<i64: 1, 1>, scalar_prefetch = 0 : i64, scratch_operands = 0 : i64, tpu.core_type = #tpu.core_type<tc>, window_params = [{transform_indices = @transform_0, window_bounds = array<i64: 8, 16>}, {transform_indices = @transform_1, window_bounds = array<i64: 8, 16>}, {transform_indices = @transform_2, window_bounds = array<i64: 8, 16>}]} {
    %c0_i32 = arith.constant 0 : i32
    %0 = arith.cmpi eq, %arg1, %c0_i32 : i32
    %1 = arith.extui %0 : i1 to i32
    %c0_i32_0 = arith.constant 0 : i32
    %2 = arith.cmpi ne, %1, %c0_i32_0 : i32
    scf.if %2 {
      %cst_19 = arith.constant 0.000000e+00 : f32
      %39 = vector.broadcast %cst_19 : f32 to vector<8x16xf32>
      %c0_20 = arith.constant 0 : index
      %c0_21 = arith.constant 0 : index
      %40 = vector.load %arg4[%c0_20, %c0_21] : memref<8x16xf32, #tpu.memory_space<vmem>>, vector<8x16xf32>
      tpu.vector_store %arg4[%c0_20, %c0_21], %39 {strides = array<i32>} : memref<8x16xf32, #tpu.memory_space<vmem>>, vector<8x16xf32>,
    } else {
    }
    %c0 = arith.constant 0 : index
    %c0_1 = arith.constant 0 : index
    %3 = vector.load %arg2[%c0, %c0_1] : memref<8x16xf32, #tpu.memory_space<vmem>>, vector<8x16xf32>
    %c0_2 = arith.constant 0 : index
    %c0_3 = arith.constant 0 : index
    %4 = vector.load %arg3[%c0_2, %c0_3] : memref<8x16xf32, #tpu.memory_space<vmem>>, vector<8x16xf32>
    %cst = arith.constant 0.000000e+00 : f32
    %5 = vector.broadcast %cst : f32 to vector<8x16xf32>
    %6 = arith.cmpf ogt, %4, %5 : vector<8x16xf32>
    %cst_4 = arith.constant 5.000000e-01 : f32
    %7 = vector.broadcast %cst_4 : f32 to vector<8x16xf32>
    %8 = arith.mulf %7, %3 : vector<8x16xf32>
    %9 = math.tanh %8 : vector<8x16xf32>
    %cst_5 = arith.constant 5.000000e-01 : f32
    %10 = vector.broadcast %cst_5 : f32 to vector<8x16xf32>
    %11 = arith.mulf %10, %9 : vector<8x16xf32>
    %cst_6 = arith.constant 5.000000e-01 : f32
    %12 = vector.broadcast %cst_6 : f32 to vector<8x16xf32>
    %13 = arith.addf %11, %12 : vector<8x16xf32>
    %cst_7 = arith.constant 1.000000e+00 : f32
    %14 = vector.broadcast %cst_7 : f32 to vector<8x16xf32>
    %15 = arith.subf %14, %13 : vector<8x16xf32>
    %cst_8 = arith.constant 5.000000e-02 : f32
    %16 = vector.broadcast %cst_8 : f32 to vector<8x16xf32>
    %17 = arith.addf %15, %16 : vector<8x16xf32>
    %cst_9 = arith.constant 1.000000e+00 : f32
    %18 = vector.broadcast %cst_9 : f32 to vector<8x16xf32>
    %19 = arith.minimumf %17, %18 : vector<8x16xf32>
    %20 = arith.select %6, %13, %19 : vector<8x16xi1>, vector<8x16xf32>
    %cst_10 = arith.constant 9.99999993E-9 : f32
    %cst_11 = arith.constant 1.000000e+00 : f32
    %21 = vector.broadcast %cst_10 : f32 to vector<8x16xf32>
    %22 = arith.maximumf %21, %20 : vector<8x16xf32>
    %23 = vector.broadcast %cst_11 : f32 to vector<8x16xf32>
    %24 = arith.minimumf %23, %22 : vector<8x16xf32>
    %25 = math.log %24 : vector<8x16xf32>
    %cst_12 = arith.constant 1.000000e+00 : f32
    %26 = vector.broadcast %cst_12 : f32 to vector<8x16xf32>
    %27 = arith.subf %26, %13 : vector<8x16xf32>
    %cst_13 = arith.constant 1.000000e+00 : f32
    %28 = vector.broadcast %cst_13 : f32 to vector<8x16xf32>
    %29 = arith.subf %28, %19 : vector<8x16xf32>
    %30 = arith.mulf %29, %29 : vector<8x16xf32>
    %31 = arith.mulf %30, %30 : vector<8x16xf32>
    %32 = arith.select %6, %27, %31 : vector<8x16xi1>, vector<8x16xf32>
    %33 = arith.mulf %25, %32 : vector<8x16xf32>
    %c0_14 = arith.constant 0 : index
    %c0_15 = arith.constant 0 : index
    %34 = vector.load %arg4[%c0_14, %c0_15] : memref<8x16xf32, #tpu.memory_space<vmem>>, vector<8x16xf32>
    %35 = vector.shape_cast %33 : vector<8x16xf32> to vector<1x8x16xf32>
    %cst_16 = arith.constant dense<0.000000e+00> : vector<8x16xf32>
    %36 = vector.multi_reduction <add>, %35, %cst_16 [0] : vector<1x8x16xf32> to vector<8x16xf32>
    %37 = arith.addf %34, %36 : vector<8x16xf32>
    %c0_17 = arith.constant 0 : index
    %c0_18 = arith.constant 0 : index
    %38 = vector.load %arg4[%c0_17, %c0_18] : memref<8x16xf32, #tpu.memory_space<vmem>>, vector<8x16xf32>
    tpu.vector_store %arg4[%c0_17, %c0_18], %37 {strides = array<i32>} : memref<8x16xf32, #tpu.memory_space<vmem>>, vector<8x16xf32>,
    return
  }
  func.func @transform_0(%arg0: i32, %arg1: i32) -> (i32, i32) {
    %c1_i32 = arith.constant 1 : i32
    %0 = arith.muli %arg0, %c1_i32 : i32
    %1 = arith.addi %0, %arg1 : i32
    %c0_i32 = arith.constant 0 : i32
    %2 = arith.minsi %1, %c0_i32 : i32
    %c0_i32_0 = arith.constant 0 : i32
    %c0_i32_1 = arith.constant 0 : i32
    return %2, %c0_i32_0 : i32, i32
  }
  func.func @transform_1(%arg0: i32, %arg1: i32) -> (i32, i32) {
    %c1_i32 = arith.constant 1 : i32
    %0 = arith.muli %arg0, %c1_i32 : i32
    %1 = arith.addi %0, %arg1 : i32
    %c0_i32 = arith.constant 0 : i32
    %2 = arith.minsi %1, %c0_i32 : i32
    %c0_i32_0 = arith.constant 0 : i32
    %c0_i32_1 = arith.constant 0 : i32
    return %2, %c0_i32_0 : i32, i32
  }
  func.func @transform_2(%arg0: i32, %arg1: i32) -> (i32, i32) {
    %c0_i32 = arith.constant 0 : i32
    %c0_i32_0 = arith.constant 0 : i32
    return %arg0, %c0_i32 : i32, i32
  }
}

</mosaic_0001>

<bundles_post_ra>
// kernel: tpu_custom_call.1
= control target key start
LH: loop header
LB: loop body
LE: loop exit
PB: predicated region body
PF: predicated region fallthrough
CT: control target
= control target key end

     0   :  { %7 = vsyncpa [#allocation3], 0  ;;  %s240_s0 = inlined_call_operand.hbm [shape: f32[8,16], index: 0, kind: input, shape index: {}]   ;;  %s241_s1 = inlined_call_operand.hbm [shape: f32[8,16], index: 1, kind: input, shape index: {}]   ;;  %s242_s2 = inlined_call_operand.hbm [shape: f32[8,16], index: 2, kind: output, shape index: {}]  }
   0x1   :  { %8 = vsyncpa [#allocation6], 0 }
   0x2   :  { %9 = vsyncpa [#allocation4], 0  ;;  %s183_s9 = smov [#allocation2]   ;;  %s184_s11 = smov [#allocation5]  }
   0x3   :  { %s21_s10 = sshll.u32 %s183_s9, 4  ;;  %s36_s12 = sshll.u32 %s184_s11, 4  ;;  %s22_s10 = int_to_ptr.vmem [resolvable:$true] %s21_s10  ;;  %s37_s12 = int_to_ptr.vmem [resolvable:$true] %s36_s12 }
   0x4   :  { %s111_s15 = scalar_lea.hbm %s240_s0, 128 }
   0x5   :  { %p112_p0 = scmp.ne.s32.totalorder %s240_s0, %s111_s15  ;;  %p115_p1 = scmp.lt.u32.totalorder %s111_s15, %s240_s0 }
   0x7   :  { %p117_p2 = pnand %p115_p1, %p112_p0 }
   0x9   :  { %120 = shalt.err (!%p117_p2)
}
   0xa   :  { %s121_s20 = scalar_lea.vmem %s22_s10, 128  ;;  %p126_p4 = scmp.lt.s32.totalorder %s22_s10, %s22_s10 }
   0xb   :  { %p122_p3 = scmp.ne.s32.totalorder %s22_s10, %s121_s20  ;;  %p127_p5 = scmp.lt.s32.totalorder %s121_s20, %s121_s20 }
   0xd   :  { %p128_p6 = por %p127_p5, %p126_p4 }
   0xf   :  { %p129_p7 = pnand %p128_p6, %p122_p3 }
  0x11   :  { %132 = shalt.err (!%p129_p7)
}
  0x12   :  { %24 = dma.hbm_to_vmem [thread:$0]  %s240_s0, 128, %s22_s10, [#allocation3]  }
  0x13   :  { %s133_s25 = scalar_lea.hbm %s241_s1, 128 }
  0x14   :  { %p134_p8 = scmp.ne.s32.totalorder %s241_s1, %s133_s25  ;;  %p137_p9 = scmp.lt.u32.totalorder %s133_s25, %s241_s1 }
  0x16   :  { %p139_p10 = pnand %p137_p9, %p134_p8 }
  0x18   :  { %142 = shalt.err (!%p139_p10)
}
  0x19   :  { %s143_s30 = scalar_lea.vmem %s37_s12, 128  ;;  %p148_p12 = scmp.lt.s32.totalorder %s37_s12, %s37_s12 }
  0x1a   :  { %p144_p11 = scmp.ne.s32.totalorder %s37_s12, %s143_s30  ;;  %p149_p13 = scmp.lt.s32.totalorder %s143_s30, %s143_s30 }
  0x1c   :  { %p150_p0 = por %p149_p13, %p148_p12 }
  0x1e   :  { %p151_p1 = pnand %p150_p0, %p144_p11 }
  0x20   :  { %154 = shalt.err (!%p151_p1)
}
  0x21   :  { %39 = dma.hbm_to_vmem [thread:$0]  %s241_s1, 128, %s37_s12, [#allocation6]  }
  0x22   :  { %177 = dma.done.wait [#allocation3], 128  }
  0x23   :  { %178 = vsyncadd [#allocation3], 4294967168 }
  0x24   :  { %179 = dma.done.wait [#allocation6], 128  }
  0x25   :  { %180 = vsyncadd [#allocation6], 4294967168  ;;  %vm56_vm0 = vcmask 130048   ;;  %v185_v0 = vmov 0.0   ;;  %v58_v1 = vld [vmem:[#allocation2] sm:$0xff]  ;;  %v59_v6 = vld [vmem:[#allocation5] sm:$0xff] }
  0x26   :  { %57 = vst.msk [vmem:[#allocation7] sm:$0xff] %vm56_vm0, %v185_v0  ;;  %v61_v2 = vmul.f32 0.5, %v58_v1  ;;  %vm60_vm1 = vcmp.gt.f32.partialorder %v59_v6, 0.0  ;;  %s186_s1 = smov [#allocation7]  }
  0x27   :  { %s89_s4 = sshll.u32 %s186_s1, 4  ;;  %s90_s4 = int_to_ptr.vmem [resolvable:$true] %s89_s4 }
  0x28   :  { %107 = vtanh.f32 %v61_v2  ;;  %s155_s5 = scalar_lea.vmem %s90_s4, 128  ;;  %p160_p3 = scmp.lt.s32.totalorder %s90_s4, %s90_s4 }
  0x29   :  { %p156_p2 = scmp.ne.s32.totalorder %s90_s4, %s155_s5  ;;  %p161_p4 = scmp.lt.s32.totalorder %s155_s5, %s155_s5 }
  0x2b   :  { %p162_p5 = por %p161_p4, %p160_p3 }
  0x2d   :  { %v78_v19 = vld [vmem:[#allocation7] sm:$0xff]  ;;  %p163_p6 = pnand %p162_p5, %p156_p2 }
  0x32   :  { %v108_v3 = vpop.eup %107 }
  0x33   :  { %v63_v4 = vmul.f32 0.5, %v108_v3 }
  0x35   :  { %v64_v5 = vadd.f32 0.5, %v63_v4 }
  0x37   :  { %v65_v7 = vsub.f32 1.0, %v64_v5 }
  0x39   :  { %v66_v8 = vadd.f32 0.05, %v65_v7 }
  0x3b   :  { %v67_v9 = vmin.f32 %v66_v8, 1.0 }
  0x3d   :  { %v68_v10 = vsel %vm60_vm1, %v64_v5, %v67_v9  ;;  %v73_v13 = vsub.f32 1.0, %v67_v9 }
  0x3e   :  { %v69_v11 = vmax.f32 %v68_v10, 1e-08 }
  0x3f   :  { %v74_v14 = vmul.f32 %v73_v13, %v73_v13 }
  0x40   :  { %v70_v12 = vmin.f32 %v69_v11, 1.0 }
  0x41   :  { %v75_v15 = vmul.f32 %v74_v14, %v74_v14 }
  0x42   :  { %109 = vlog2.f32 %v70_v12 }
  0x43   :  { %v76_v17 = vsel %vm60_vm1, %v65_v7, %v75_v15 }
  0x4c   :  { %v110_v16 = vpop.eup %109 }
  0x4d   :  { %v72_v18 = vmul.f32 0.6931472, %v110_v16 }
  0x4f   :  { %v77_v20 = vmul.f32 %v76_v17, %v72_v18 }
  0x51   :  { %v80_v21 = vadd.f32 %v78_v19, %v77_v20 }
  0x53   :  { %82 = vst.msk [vmem:[#allocation7] sm:$0xff] %vm56_vm0, %v80_v21 }
  0x54   :  { %166 = shalt.err (!%p163_p6)
}
  0x55   :  { %s167_s8 = scalar_lea.hbm %s242_s2, 128 }
  0x56   :  { %p168_p7 = scmp.ne.s32.totalorder %s242_s2, %s167_s8  ;;  %p171_p8 = scmp.lt.u32.totalorder %s167_s8, %s242_s2 }
  0x58   :  { %p173_p9 = pnand %p171_p8, %p168_p7 }
  0x5a   :  { %176 = shalt.err (!%p173_p9)
}
  0x5b   :  { %92 = dma.vmem_to_hbm [thread:$0]  %s90_s4, 128, %s242_s2, [#allocation4]  }
  0x5c   :  { %181 = dma.done.wait [#allocation4], 128  }
  0x5d   :  { %182 = vsyncadd [#allocation4], 4294967168 }
  0x5e   :  { %96 = vsyncpa [#allocation3], 1 }
  0x5f   :  { %97 = vsyncpa [#allocation6], 1 }
  0x60   :  { %98 = vsyncpa [#allocation4], 1 }

</bundles_post_ra>
